<compile_context>
chip_gen: v6e
topology: v6e:2x2x1
jax: 0.10.0
libtpu: 0.0.40
codegen_flags: <defaults>
</compile_context>

<pallas_src>
import jax
import jax.numpy as jnp
from jax.experimental import pallas as pl
from jax.experimental.pallas import tpu as pltpu


def _collate_kernel(img_ref, ab_ref, out_ref):
    """One grid step: a (TR, TL) tile of flattened pixels -> both views.

    img_ref : (TR, TL)       source pixels (native dtype); rows = (image, channel)
    ab_ref  : (2, 2, TR, 1)  [view, {scale, offset}, row, 1] folded affine consts
    out_ref : (2, TR, TL)    both augmented views of the tile
    """
    x = img_ref[...].astype(jnp.float32)
    out_ref[0, ...] = (x * ab_ref[0, 0, :, :] + ab_ref[0, 1, :, :]).astype(out_ref.dtype)
    out_ref[1, ...] = (x * ab_ref[1, 0, :, :] + ab_ref[1, 1, :, :]).astype(out_ref.dtype)


def _divisors_mult(n, m):
    """Divisors of n that are multiples of m, descending; falls back to [n]."""
    ds = [d for d in range(m, n + 1, m) if n % d == 0]
    return sorted(ds, reverse=True) or [n]


def _vmem_budget():
    """Generation-aware (tile_budget, vmem_limit_bytes)."""
    try:
        cap = int(pltpu.get_tpu_info().vmem_capacity_bytes)
    except Exception:
        cap = 64 << 20  # conservative: v7x per-TensorCore VMEM
    vmem_limit = min((cap * 3) // 4, 96 << 20)   # 96 MiB on v5e/v6e, 48 MiB on v7x
    tile_budget = vmem_limit // 2                # double-buffered tiles, with headroom
    return tile_budget, vmem_limit


def _pick_tiles(N, HWp, in_bytes, out_bytes, budget):
    """Largest (TR, TL) tile (rows x lanes) whose double-buffered footprint fits."""
    def tile_bytes(tr, tl):
        # input tile + 2 output views + lane-padded affine block, x2 for double buffer.
        per = tr * tl * (in_bytes + 2 * out_bytes) + 2 * 2 * tr * 128 * 4
        return 2 * per

    row_divs = _divisors_mult(N, 8)       # sublane-aligned row tiles (or full N)
    col_divs = _divisors_mult(HWp, 128)   # lane-aligned column tiles
    best = None
    for tr in row_divs:
        for tl in col_divs:
            if tile_bytes(tr, tl) <= budget:
                if best is None or tr * tl > best[0] * best[1]:
                    best = (tr, tl)
    if best is None:
        best = (row_divs[-1], col_divs[-1])  # smallest legal tile
    return best


def base_collate_forward(images, labels, fnames, mean, std, scales, shifts,
                         out_dtype=jnp.float32):
    """Pallas implementation of BaseCollateFunction.forward.

    images : (B, C, H, W)          -- the batch of input images (any real dtype)
    labels : (B,) int32            -- analog of the PyTorch LongTensor labels
    fnames : list[str]
    mean, std : (C,) float32       -- normalization parameters
    scales, shifts : (2*B,) float32 -- per-view "random" jitter parameters
    Returns ((img_t0, img_t1), labels, fnames) with img_t* of shape (B, C, H, W).
    """
    B, C, H, W = images.shape
    HW = H * W
    N = B * C

    # Sublane-dense view: rows are (image, channel), columns are pixels.
    imgs2d = images.reshape(N, HW)
    # Lane-dense output: pad pixel axis to a multiple of 128 if necessary.
    HWp = ((HW + 127) // 128) * 128
    if HWp != HW:
        imgs2d = jnp.pad(imgs2d, ((0, 0), (0, HWp - HW)))

    # Fold jitter + normalization into per-(view, row) affine constants and fuse
    # them into one small array so each grid step issues a single extra DMA.
    inv_std = (1.0 / std).astype(jnp.float32)                      # (C,)
    mean_f = mean.astype(jnp.float32)                              # (C,)
    sc = scales.reshape(2, B).astype(jnp.float32)                  # (2, B)
    sh = shifts.reshape(2, B).astype(jnp.float32)                  # (2, B)
    a = sc[:, :, None] * inv_std[None, None, :]                    # (2, B, C)
    b = (sh[:, :, None] - mean_f[None, None, :]) * inv_std[None, None, :]
    ab = jnp.stack([a, b], axis=1).reshape(2, 2, N, 1)             # (2, 2, N, 1)

    in_bytes = imgs2d.dtype.itemsize
    out_bytes = jnp.dtype(out_dtype).itemsize
    tile_budget, vmem_limit = _vmem_budget()
    TR, TL = _pick_tiles(N, HWp, in_bytes, out_bytes, tile_budget)

    # Prefer >= 2 grid steps when the problem is big enough so both v7x
    # TensorCores get work (and pipelining has something to overlap).
    total_bytes = N * HWp * (in_bytes + 2 * out_bytes)
    if (N // TR) * (HWp // TL) == 1 and total_bytes > (4 << 20):
        if TL % 256 == 0:
            TL //= 2
        elif TR % 16 == 0:
            TR //= 2
    grid = (N // TR, HWp // TL)

    cost = pl.CostEstimate(
        flops=4 * N * HWp,  # one FMA per element per view
        transcendentals=0,
        bytes_accessed=N * HWp * in_bytes + 2 * N * HWp * out_bytes + ab.size * 4,
    )

    out = pl.pallas_call(
        _collate_kernel,
        out_shape=jax.ShapeDtypeStruct((2, N, HWp), out_dtype),
        grid_spec=pltpu.PrefetchScalarGridSpec(
            num_scalar_prefetch=0,
            grid=grid,
            in_specs=[
                # source pixels: read once per tile, sublane- and lane-dense.
                pl.BlockSpec((TR, TL), lambda r, c: (r, c)),
                # fused per-(view, row) affine constants (tiny).
                pl.BlockSpec((2, 2, TR, 1), lambda r, c: (0, 0, r, 0)),
            ],
            out_specs=pl.BlockSpec((2, TR, TL), lambda r, c: (0, r, c)),
        ),
        compiler_params=pltpu.CompilerParams(
            dimension_semantics=("parallel", "parallel"),
            vmem_limit_bytes=vmem_limit,
        ),
        cost_estimate=cost,
    )(imgs2d, ab)

    if HWp != HW:
        out = out[..., :HW]
    img_t0 = out[0].reshape(B, C, H, W)
    img_t1 = out[1].reshape(B, C, H, W)
    # Labels pass through unchanged (int32 here vs. PyTorch's int64 LongTensor).
    return (img_t0, img_t1), labels, fnames


def _reference(images, mean, std, scales, shifts):
    B = images.shape[0]
    x2 = jnp.concatenate([images, images], axis=0).astype(jnp.float32)
    s = scales.reshape(2 * B, 1, 1, 1)
    t = shifts.reshape(2 * B, 1, 1, 1)
    m = mean.reshape(1, -1, 1, 1)
    sd = std.reshape(1, -1, 1, 1)
    y = ((x2 * s + t) - m) / sd
    return y[:B], y[B:]


if __name__ == "__main__":
    B, C, H, W = 2, 4, 16, 16

    key = jax.random.PRNGKey(0)
    k_img, k_scale, k_shift = jax.random.split(key, 3)

    # "batch of tuples": images, integer labels, filenames
    images = jax.random.uniform(k_img, (B, C, H, W), dtype=jnp.float32)
    labels = jnp.arange(B, dtype=jnp.int32)          # PyTorch LongTensor analog
    fnames = [f"img_{i}.png" for i in range(B)]

    # Deterministic "random transform" parameters (two views per image).
    scales = jax.random.uniform(k_scale, (2 * B,), minval=0.8, maxval=1.2).astype(
        jnp.float32
    )
    shifts = jax.random.uniform(k_shift, (2 * B,), minval=-0.1, maxval=0.1).astype(
        jnp.float32
    )

    # Deterministic normalization parameters (per channel).
    mean = jnp.linspace(0.4, 0.5, C, dtype=jnp.float32)
    std = jnp.linspace(0.2, 0.3, C, dtype=jnp.float32)

    (img_t0, img_t1), out_labels, out_fnames = base_collate_forward(
        images, labels, fnames, mean, std, scales, shifts
    )
    jax.block_until_ready((img_t0, img_t1, out_labels))

    # correctness check vs pure-JAX reference
    ref_t0, ref_t1 = _reference(images, mean, std, scales, shifts)
    assert img_t0.shape == (B, C, H, W) and img_t1.shape == (B, C, H, W)
    assert jnp.allclose(img_t0, ref_t0, atol=1e-5, rtol=1e-5)
    assert jnp.allclose(img_t1, ref_t1, atol=1e-5, rtol=1e-5)
    assert out_fnames == fnames
    assert jnp.array_equal(out_labels, labels)

    print("KERNEL_OK")
</pallas_src>

<mosaic_0001>
module attributes {stable_mosaic.version = 11 : i64} {
  func.func @_collate_kernel(%arg0: i32, %arg1: i32, %arg2: memref<8x256xf32, #tpu.memory_space<vmem>>, %arg3: memref<2x2x8x1xf32, #tpu.memory_space<vmem>>, %arg4: memref<2x8x256xf32, #tpu.memory_space<vmem>>) attributes {dimension_semantics = [#tpu.dimension_semantics<parallel>, #tpu.dimension_semantics<parallel>], iteration_bounds = array<i64: 1, 1>, scalar_prefetch = 0 : i64, scratch_operands = 0 : i64, tpu.core_type = #tpu.core_type<tc>, window_params = [{transform_indices = @transform_0, window_bounds = array<i64: 8, 256>}, {transform_indices = @transform_1, window_bounds = array<i64: 2, 2, 8, 1>}, {transform_indices = @transform_2, window_bounds = array<i64: 2, 8, 256>}]} {
    %c0 = arith.constant 0 : index
    %c0_0 = arith.constant 0 : index
    %0 = vector.load %arg2[%c0, %c0_0] : memref<8x256xf32, #tpu.memory_space<vmem>>, vector<8x256xf32>
    %c0_1 = arith.constant 0 : index
    %c0_2 = arith.constant 0 : index
    %c0_3 = arith.constant 0 : index
    %c0_4 = arith.constant 0 : index
    %1 = vector.load %arg3[%c0_1, %c0_2, %c0_3, %c0_4] : memref<2x2x8x1xf32, #tpu.memory_space<vmem>>, vector<1x1x8x1xf32>
    %2 = vector.shape_cast %1 : vector<1x1x8x1xf32> to vector<8x1xf32>
    %3 = vector.broadcast %2 : vector<8x1xf32> to vector<8x256xf32>
    %4 = arith.mulf %0, %3 : vector<8x256xf32>
    %c0_5 = arith.constant 0 : index
    %c1 = arith.constant 1 : index
    %c0_6 = arith.constant 0 : index
    %c0_7 = arith.constant 0 : index
    %5 = vector.load %arg3[%c0_5, %c1, %c0_6, %c0_7] : memref<2x2x8x1xf32, #tpu.memory_space<vmem>>, vector<1x1x8x1xf32>
    %6 = vector.shape_cast %5 : vector<1x1x8x1xf32> to vector<8x1xf32>
    %7 = vector.broadcast %6 : vector<8x1xf32> to vector<8x256xf32>
    %8 = arith.addf %4, %7 : vector<8x256xf32>
    %c0_8 = arith.constant 0 : index
    %c0_9 = arith.constant 0 : index
    %c0_10 = arith.constant 0 : index
    %9 = vector.load %arg4[%c0_8, %c0_9, %c0_10] : memref<2x8x256xf32, #tpu.memory_space<vmem>>, vector<1x8x256xf32>
    %10 = vector.shape_cast %9 : vector<1x8x256xf32> to vector<8x256xf32>
    %11 = vector.shape_cast %8 : vector<8x256xf32> to vector<1x8x256xf32>
    tpu.vector_store %arg4[%c0_8, %c0_9, %c0_10], %11 {strides = array<i32>} : memref<2x8x256xf32, #tpu.memory_space<vmem>>, vector<1x8x256xf32>,
    %c1_11 = arith.constant 1 : index
    %c0_12 = arith.constant 0 : index
    %c0_13 = arith.constant 0 : index
    %c0_14 = arith.constant 0 : index
    %12 = vector.load %arg3[%c1_11, %c0_12, %c0_13, %c0_14] : memref<2x2x8x1xf32, #tpu.memory_space<vmem>>, vector<1x1x8x1xf32>
    %13 = vector.shape_cast %12 : vector<1x1x8x1xf32> to vector<8x1xf32>
    %14 = vector.broadcast %13 : vector<8x1xf32> to vector<8x256xf32>
    %15 = arith.mulf %0, %14 : vector<8x256xf32>
    %c1_15 = arith.constant 1 : index
    %c1_16 = arith.constant 1 : index
    %c0_17 = arith.constant 0 : index
    %c0_18 = arith.constant 0 : index
    %16 = vector.load %arg3[%c1_15, %c1_16, %c0_17, %c0_18] : memref<2x2x8x1xf32, #tpu.memory_space<vmem>>, vector<1x1x8x1xf32>
    %17 = vector.shape_cast %16 : vector<1x1x8x1xf32> to vector<8x1xf32>
    %18 = vector.broadcast %17 : vector<8x1xf32> to vector<8x256xf32>
    %19 = arith.addf %15, %18 : vector<8x256xf32>
    %c1_19 = arith.constant 1 : index
    %c0_20 = arith.constant 0 : index
    %c0_21 = arith.constant 0 : index
    %20 = vector.load %arg4[%c1_19, %c0_20, %c0_21] : memref<2x8x256xf32, #tpu.memory_space<vmem>>, vector<1x8x256xf32>
    %21 = vector.shape_cast %20 : vector<1x8x256xf32> to vector<8x256xf32>
    %22 = vector.shape_cast %19 : vector<8x256xf32> to vector<1x8x256xf32>
    tpu.vector_store %arg4[%c1_19, %c0_20, %c0_21], %22 {strides = array<i32>} : memref<2x8x256xf32, #tpu.memory_space<vmem>>, vector<1x8x256xf32>,
    return
  }
  func.func @transform_0(%arg0: i32, %arg1: i32) -> (i32, i32) {
    %c0_i32 = arith.constant 0 : i32
    return %arg0, %arg1 : i32, i32
  }
  func.func @transform_1(%arg0: i32, %arg1: i32) -> (i32, i32, i32, i32) {
    %c0_i32 = arith.constant 0 : i32
    %c0_i32_0 = arith.constant 0 : i32
    %c0_i32_1 = arith.constant 0 : i32
    %c0_i32_2 = arith.constant 0 : i32
    return %c0_i32, %c0_i32_0, %arg0, %c0_i32_1 : i32, i32, i32, i32
  }
  func.func @transform_2(%arg0: i32, %arg1: i32) -> (i32, i32, i32) {
    %c0_i32 = arith.constant 0 : i32
    %c0_i32_0 = arith.constant 0 : i32
    return %c0_i32, %arg0, %arg1 : i32, i32, i32
  }
}

</mosaic_0001>

<bundles_post_ra>
// kernel: tpu_custom_call.1
= control target key start
LH: loop header
LB: loop body
LE: loop exit
PB: predicated region body
PF: predicated region fallthrough
CT: control target
= control target key end

     0   :  { %v101_v2 = vmov 0   ;;  %s141_s0 = inlined_call_operand.vmem [shape: f32[8,256], index: 0, kind: input, shape index: {}]   ;;  %s142_s1 = inlined_call_operand.vmem [shape: f32[2,2,8,1], index: 1, kind: input, shape index: {}]   ;;  %s143_s2 = inlined_call_operand.hbm [shape: f32[2,8,256], index: 2, kind: output, shape index: {}]  }
   0x1   :  { %v70_v0 = vld [vmem:[%s142_s1 + $0x8] sm:$0xff]  ;;  %v14_v1 = vld [vmem:[%s142_s1] sm:$0xff]  ;;  %78 = vset.pattern.permute.xlu1 %v101_v2  ;;  %77 = vset.pattern.permute.xlu0 %v101_v2 }
   0x2   :  { %26 = vperm.xlu1 %78, %v70_v0   ;;  %17 = vperm.xlu0 %77, %v14_v1  }
   0x3   :  { %7 = vsyncpa [#allocation3], 0  ;;  %v72_v3 = vld [vmem:[%s142_s1 + $0x18] sm:$0xff]  ;;  %v71_v4 = vld [vmem:[%s142_s1 + $0x10] sm:$0xff]  ;;  %s102_s21 = smov [#allocation2]  }
   0x4   :  { %v12_v5 = vld [vmem:[%s141_s0] sm:$0xff]  ;;  %v13_v6 = vld [vmem:[%s141_s0 + $0x8] sm:$0xff]  ;;  %s59_s22 = sshll.u32 %s102_s21, 4  ;;  %s60_s22 = int_to_ptr.vmem [resolvable:$true] %s59_s22 }
   0x5   :  { %s79_s0 = scalar_lea.vmem %s60_s22, 512  ;;  %p84_p1 = scmp.lt.s32.totalorder %s60_s22, %s60_s22 }
   0x6   :  { %46 = vperm.xlu1 %78, %v72_v3   ;;  %37 = vperm.xlu0 %77, %v71_v4   ;;  %p80_p0 = scmp.ne.s32.totalorder %s60_s22, %s79_s0  ;;  %p85_p2 = scmp.lt.s32.totalorder %s79_s0, %s79_s0 }
   0x8   :  { %p86_p3 = por %p85_p2, %p84_p1 }
   0xa   :  { %p87_p4 = pnand %p86_p3, %p80_p0 }
  0x7d   :  { %v27_v7 = vpop.permute.xlu1 %26  ;;  %v18_v8 = vpop.permute.xlu0 %17 }
  0x7e   :  { %v20_v9 = vmul.f32 %v18_v8, %v12_v5  ;;  %v21_v10 = vmul.f32 %v18_v8, %v13_v6 }
  0x80   :  { %v29_v11 = vadd.f32 %v27_v7, %v20_v9  ;;  %v30_v12 = vadd.f32 %v27_v7, %v21_v10 }
  0x81   :  { %v38_v13 = vpop.permute.xlu0 %37  ;;  %v47_v16 = vpop.permute.xlu1 %46 }
  0x82   :  { %31 = vst [vmem:[#allocation2] sm:$0xff] %v29_v11  ;;  %32 = vst [vmem:[#allocation2 + $0x8] sm:$0xff] %v30_v12  ;;  %v40_v14 = vmul.f32 %v38_v13, %v12_v5  ;;  %v41_v15 = vmul.f32 %v38_v13, %v13_v6 }
  0x84   :  { %v49_v17 = vadd.f32 %v47_v16, %v40_v14  ;;  %v50_v18 = vadd.f32 %v47_v16, %v41_v15 }
  0x86   :  { %52 = vst [vmem:[#allocation2 + $0x10] sm:$0xff] %v49_v17  ;;  %53 = vst [vmem:[#allocation2 + $0x18] sm:$0xff] %v50_v18 }
  0x87   :  { %90 = shalt.err (!%p87_p4)
}
  0x88   :  { %s103_s1 = smov 256   ;;  %s104_s23 = smov 16  }
  0x89   :  { %65 = dma.vmem_to_hbm [thread:$0]  %s60_s22, 512, %s143_s2, [#allocation3], %s103_s1, %s103_s1, %s104_s23  }
  0x8a   :  { %99 = dma.done.wait [#allocation3], 512  }
  0x8b   :  { %100 = vsyncadd [#allocation3], 4294966784 }
  0x8c   :  { %69 = vsyncpa [#allocation3], 1 }

</bundles_post_ra>
